<compile_context>
chip_gen: v6e
topology: v6e:2x2x1
jax: 0.10.0
libtpu: 0.0.40
codegen_flags: <defaults>
</compile_context>

<pallas_src>
import jax
import jax.numpy as jnp
from jax.experimental import pallas as pl
from jax.experimental.pallas import tpu as pltpu


def _round_up(x, m):
    return (x + m - 1) // m * m


def _calibrator_kernel(pp_ref, wbd_ref, b_ref, ones_ref, out_ref):
    # Lane-packed probabilities: `pack` logical samples per 128-lane row.
    # bf16 MXU operands with f32 accumulation (v5e MXU is bf16-native; harmless on v6e/v7x).
    pp = pp_ref[...].astype(jnp.bfloat16)                     # (tile_rows, W)

    # Linear layer: per-segment p @ W^T + b as one dense 128-wide MXU matmul.
    logits = jnp.dot(pp, wbd_ref[...],
                     preferred_element_type=jnp.float32) + b_ref[...]

    # Packed-row max is a constant shift within every C-wide segment, so each segment's
    # softmax is unchanged and every exp argument stays <= 0 (no overflow).  One XLU
    # reduce serves `pack` logical samples.
    m = jnp.max(logits, axis=-1, keepdims=True)
    e = jnp.exp(logits - m)

    # Segmented sum of exp via block-diagonal ones: broadcasts each segment's sum to its
    # own lanes on the otherwise-idle MXU slot.  Numerator and denominator are built from
    # the SAME bf16 rounding of e, so every output segment sums to exactly 1 (f32 exact
    # divide instead of the approximate reciprocal that broke normalization).
    e_b = e.astype(jnp.bfloat16)
    denom = jnp.dot(e_b, ones_ref[...], preferred_element_type=jnp.float32)
    out_ref[...] = (e_b.astype(jnp.float32) / denom).astype(out_ref.dtype)


def _prepare_params(weight, bias, pack):
    """Build the lane-packed constants once (cache these for a fixed calibrator)."""
    C = weight.shape[0]
    wt = weight.astype(jnp.float32).T                                        # (C_in, C_out)
    w_bd = jnp.kron(jnp.eye(pack, dtype=jnp.float32), wt).astype(jnp.bfloat16)   # (W, W)
    b_packed = jnp.tile(bias.astype(jnp.float32).reshape(1, C), (1, pack))       # (1, W) f32
    seg = jnp.arange(pack * C) // C
    ones_bd = (seg[:, None] == seg[None, :]).astype(jnp.bfloat16)                # (W, W)
    return w_bd, b_packed, ones_bd


def _apply_calibrator(p, w_bd, b_packed, ones_bd, pack, n_classes, tile_rows):
    N, C = p.shape
    assert C == n_classes
    W = pack * C

    # Pad only to a multiple of `pack` (<= pack-1 rows, usually zero) so the
    # (N, C) -> (rows, pack*C) lane-packing reshape is exact.  No padding to a tile
    # multiple: the grid's last block is ragged and Pallas masks the OOB writeback.
    N_pack = _round_up(N, pack)
    if N_pack != N:
        p = jnp.pad(p, ((0, N_pack - N), (0, 0)))
    rows = N_pack // pack
    pp = p.reshape(rows, W)                     # contiguous HBM reshape (layout only)

    if tile_rows is None:
        # Big tiles for HBM roofline (per-step overhead ~0.35us), but keep >= ~16 grid
        # steps so v7x's two TensorCores both get work; the 2048-row cap keeps per-step
        # VMEM (in/out double buffers + f32 temporaries ~ 10 MiB) inside even v5e's
        # 16 MiB scoped default and v7x's 64 MiB physical VMEM.
        tile_rows = min(2048, _round_up(pl.cdiv(rows, 16), 8))
    tile_rows = max(8, _round_up(tile_rows, 8))   # f32 sublane (8, 128) constraint
    if tile_rows >= rows:
        tile_rows = rows                          # single block == full array (always legal)

    grid = (pl.cdiv(rows, tile_rows),)

    itemsize = p.dtype.itemsize
    cost = pl.CostEstimate(
        flops=2 * rows * W * W            # linear layer (dense block-diag W^T on MXU)
              + 2 * rows * W * W          # segmented softmax denominator (block-diag ones)
              + 6 * rows * W,             # bias add, max shift, divide epilogue
        transcendentals=rows * W,         # exp
        bytes_accessed=2 * rows * W * itemsize + 2 * W * W * 2 + W * 4,
    )

    out = pl.pallas_call(
        _calibrator_kernel,
        out_shape=jax.ShapeDtypeStruct((rows, W), p.dtype),
        grid_spec=pltpu.PrefetchScalarGridSpec(
            num_scalar_prefetch=0,
            grid=grid,
            in_specs=[
                pl.BlockSpec((tile_rows, W), lambda i: (i, 0)),  # packed probabilities (streamed)
                pl.BlockSpec((W, W), lambda i: (0, 0)),          # block-diag W^T (bf16, fetched once)
                pl.BlockSpec((1, W), lambda i: (0, 0)),          # packed bias (f32)
                pl.BlockSpec((W, W), lambda i: (0, 0)),          # block-diag ones (bf16)
            ],
            out_specs=pl.BlockSpec((tile_rows, W), lambda i: (i, 0)),  # 128-lane dense stores
        ),
        compiler_params=pltpu.CompilerParams(
            dimension_semantics=("parallel",),   # row tiles shard across v7x's 2 TCs
        ),
        cost_estimate=cost,
    )(pp, w_bd, b_packed, ones_bd)

    out = out.reshape(N_pack, C)
    return out[:N] if N_pack != N else out


def make_linear_calibrator(weight, bias, *, tile_rows=None):
    """Factory: precompute packed parameters once; returns a jitted p -> softmax(p @ W^T + b).

    Accepts f32 or bf16 `p`; output dtype matches input (bf16 I/O halves HBM traffic for
    this bandwidth-bound kernel if the caller can tolerate it).
    """
    C = weight.shape[0]
    pack = 128 // C if (C <= 128 and 128 % C == 0) else 1
    w_bd, b_packed, ones_bd = _prepare_params(weight, bias, pack)

    @jax.jit
    def apply(p):
        return _apply_calibrator(p, w_bd, b_packed, ones_bd, pack, C, tile_rows)

    return apply


def linear_calibrator(p, weight, bias, *, tile_rows=None):
    """One-off convenience wrapper (prefer make_linear_calibrator for repeated calls)."""
    C = weight.shape[0]
    pack = 128 // C if (C <= 128 and 128 % C == 0) else 1
    w_bd, b_packed, ones_bd = _prepare_params(weight, bias, pack)
    return _apply_calibrator(p, w_bd, b_packed, ones_bd, pack, C, tile_rows)


def _reference(p, weight, bias):
    logits = p @ weight.T + bias
    return jax.nn.softmax(logits, axis=-1)


if __name__ == "__main__":
    key = jax.random.PRNGKey(0)
    n_samples, n_classes = 8, 32
    k_p, k_w, k_b = jax.random.split(key, 3)

    # Deterministic parameter init (mirrors nn.Linear's uniform(-1/sqrt(in), 1/sqrt(in))).
    bound = 1.0 / jnp.sqrt(n_classes)
    weight = jax.random.uniform(k_w, (n_classes, n_classes), jnp.float32, -bound, bound)
    bias = jax.random.uniform(k_b, (n_classes,), jnp.float32, -bound, bound)

    # Input: probability vectors (rows sum to 1), like the base-model output.
    p = jax.nn.softmax(jax.random.normal(k_p, (n_samples, n_classes), jnp.float32), axis=-1)

    # Cached-parameter (factory) path.
    calibrate = make_linear_calibrator(weight, bias)
    out = jax.block_until_ready(calibrate(p))
    ref = _reference(p, weight, bias)
    assert out.shape == (n_samples, n_classes)
    # bf16 MXU operands with f32 accumulation -> a few e-4 absolute error vs f32 reference.
    assert jnp.allclose(out, ref, atol=2e-3, rtol=2e-3), "mismatch vs reference"
    # Exact f32 divide with matched numerator/denominator -> rows sum to 1 to f32 precision.
    assert jnp.allclose(jnp.sum(out, axis=-1), 1.0, atol=1e-3), "softmax rows must ~sum to 1"

    # Exercise the ragged-last-block multi-step grid path (rows not a multiple of tile_rows).
    n2 = 300
    p2 = jax.nn.softmax(
        jax.random.normal(jax.random.PRNGKey(1), (n2, n_classes), jnp.float32), axis=-1
    )
    out2 = jax.block_until_ready(linear_calibrator(p2, weight, bias, tile_rows=8))
    ref2 = _reference(p2, weight, bias)
    assert out2.shape == (n2, n_classes)
    assert jnp.allclose(out2, ref2, atol=2e-3, rtol=2e-3), "mismatch vs reference (tiled)"
    assert jnp.allclose(jnp.sum(out2, axis=-1), 1.0, atol=1e-3), "tiled rows must ~sum to 1"

    print("KERNEL_OK")
</pallas_src>

<mosaic_0001>
module attributes {stable_mosaic.version = 11 : i64} {
  func.func @_calibrator_kernel(%arg0: i32, %arg1: memref<2x128xf32, #tpu.memory_space<vmem>>, %arg2: memref<128x128xbf16, #tpu.memory_space<vmem>>, %arg3: memref<1x128xf32, #tpu.memory_space<vmem>>, %arg4: memref<128x128xbf16, #tpu.memory_space<vmem>>, %arg5: memref<2x128xf32, #tpu.memory_space<vmem>>) attributes {dimension_semantics = [#tpu.dimension_semantics<parallel>], iteration_bounds = array<i64: 1>, scalar_prefetch = 0 : i64, scratch_operands = 0 : i64, tpu.core_type = #tpu.core_type<tc>, window_params = [{transform_indices = @transform_0, window_bounds = array<i64: 2, 128>}, {pipeline_mode = #tpu.pipeline_mode<synchronous>, transform_indices = @transform_1, window_bounds = array<i64: 128, 128>}, {pipeline_mode = #tpu.pipeline_mode<synchronous>, transform_indices = @transform_2, window_bounds = array<i64: 1, 128>}, {pipeline_mode = #tpu.pipeline_mode<synchronous>, transform_indices = @transform_3, window_bounds = array<i64: 128, 128>}, {transform_indices = @transform_4, window_bounds = array<i64: 2, 128>}]} {
    %c0 = arith.constant 0 : index
    %c0_0 = arith.constant 0 : index
    %0 = vector.load %arg1[%c0, %c0_0] : memref<2x128xf32, #tpu.memory_space<vmem>>, vector<2x128xf32>
    %1 = arith.truncf %0 : vector<2x128xf32> to vector<2x128xbf16>
    %c0_1 = arith.constant 0 : index
    %c0_2 = arith.constant 0 : index
    %2 = vector.load %arg2[%c0_1, %c0_2] : memref<128x128xbf16, #tpu.memory_space<vmem>>, vector<128x128xbf16>
    %cst = arith.constant dense<0.000000e+00> : vector<2x128xf32>
    %3 = tpu.matmul %1, %2, %cst {dimension_numbers = #tpu.dot_dimension_numbers<[1], [0], [0], [1], [0, 0, 1, 1], [], []>} : vector<2x128xbf16>, vector<128x128xbf16>, vector<2x128xf32> -> vector<2x128xf32>
    %c0_3 = arith.constant 0 : index
    %c0_4 = arith.constant 0 : index
    %4 = vector.load %arg3[%c0_3, %c0_4] : memref<1x128xf32, #tpu.memory_space<vmem>>, vector<1x128xf32>
    %5 = vector.broadcast %4 : vector<1x128xf32> to vector<2x128xf32>
    %6 = arith.addf %3, %5 : vector<2x128xf32>
    %cst_5 = arith.constant dense<0xFF800000> : vector<2xf32>
    %7 = vector.multi_reduction <maximumf>, %6, %cst_5 [1] : vector<2x128xf32> to vector<2xf32>
    %8 = vector.shape_cast %7 : vector<2xf32> to vector<2x1xf32>
    %9 = vector.broadcast %8 : vector<2x1xf32> to vector<2x128xf32>
    %10 = arith.subf %6, %9 : vector<2x128xf32>
    %11 = math.exp %10 : vector<2x128xf32>
    %12 = arith.truncf %11 : vector<2x128xf32> to vector<2x128xbf16>
    %c0_6 = arith.constant 0 : index
    %c0_7 = arith.constant 0 : index
    %13 = vector.load %arg4[%c0_6, %c0_7] : memref<128x128xbf16, #tpu.memory_space<vmem>>, vector<128x128xbf16>
    %cst_8 = arith.constant dense<0.000000e+00> : vector<2x128xf32>
    %14 = tpu.matmul %12, %13, %cst_8 {dimension_numbers = #tpu.dot_dimension_numbers<[1], [0], [0], [1], [0, 0, 1, 1], [], []>} : vector<2x128xbf16>, vector<128x128xbf16>, vector<2x128xf32> -> vector<2x128xf32>
    %15 = arith.extf %12 : vector<2x128xbf16> to vector<2x128xf32>
    %16 = arith.divf %15, %14 : vector<2x128xf32>
    %c0_9 = arith.constant 0 : index
    %c0_10 = arith.constant 0 : index
    %17 = vector.load %arg5[%c0_9, %c0_10] : memref<2x128xf32, #tpu.memory_space<vmem>>, vector<2x128xf32>
    tpu.vector_store %arg5[%c0_9, %c0_10], %16 {strides = array<i32>} : memref<2x128xf32, #tpu.memory_space<vmem>>, vector<2x128xf32>,
    return
  }
  func.func @transform_0(%arg0: i32) -> (i32, i32) {
    %c0_i32 = arith.constant 0 : i32
    %c0_i32_0 = arith.constant 0 : i32
    return %arg0, %c0_i32 : i32, i32
  }
  func.func @transform_1(%arg0: i32) -> (i32, i32) {
    %c0_i32 = arith.constant 0 : i32
    %c0_i32_0 = arith.constant 0 : i32
    %c0_i32_1 = arith.constant 0 : i32
    return %c0_i32, %c0_i32_0 : i32, i32
  }
  func.func @transform_2(%arg0: i32) -> (i32, i32) {
    %c0_i32 = arith.constant 0 : i32
    %c0_i32_0 = arith.constant 0 : i32
    %c0_i32_1 = arith.constant 0 : i32
    return %c0_i32, %c0_i32_0 : i32, i32
  }
  func.func @transform_3(%arg0: i32) -> (i32, i32) {
    %c0_i32 = arith.constant 0 : i32
    %c0_i32_0 = arith.constant 0 : i32
    %c0_i32_1 = arith.constant 0 : i32
    return %c0_i32, %c0_i32_0 : i32, i32
  }
  func.func @transform_4(%arg0: i32) -> (i32, i32) {
    %c0_i32 = arith.constant 0 : i32
    %c0_i32_0 = arith.constant 0 : i32
    return %arg0, %c0_i32 : i32, i32
  }
}

</mosaic_0001>

<bundles_post_ra>
// kernel: apply.1
= control target key start
LH: loop header
LB: loop body
LE: loop exit
PB: predicated region body
PF: predicated region fallthrough
CT: control target
= control target key end

     0   :  { %9 = vsyncpa [#allocation3], 0  ;;  %s472_s0 = inlined_call_operand.vmem [shape: f32[2,128], index: 0, kind: input, shape index: {}]   ;;  %s473_s1 = inlined_call_operand.hbm [shape: bf16[128,128], index: 1, kind: input, shape index: {}]   ;;  %s474_s2 = inlined_call_operand.vmem [shape: f32[1,128], index: 2, kind: input, shape index: {}]   ;;  %s475_s3 = inlined_call_operand.hbm [shape: bf16[128,128], index: 3, kind: input, shape index: {}]   ;;  %s476_s4 = inlined_call_operand.vmem [shape: f32[2,128], index: 4, kind: output, shape index: {}]  }
   0x1   :  { %10 = vsyncpa [#allocation5], 0  ;;  %s426_s15 = smov [#allocation2]  }
   0x2   :  { %s18_s16 = sshll.u32 %s426_s15, 4  ;;  %s19_s16 = int_to_ptr.vmem [resolvable:$true] %s18_s16 }
   0x3   :  { %s390_s17 = scalar_lea.vmem %s19_s16, 1024  ;;  %p395_p1 = scmp.lt.s32.totalorder %s19_s16, %s19_s16 }
   0x4   :  { %p391_p0 = scmp.ne.s32.totalorder %s19_s16, %s390_s17  ;;  %p396_p2 = scmp.lt.s32.totalorder %s390_s17, %s390_s17 }
   0x6   :  { %p397_p3 = por %p396_p2, %p395_p1 }
   0x8   :  { %p398_p4 = pnand %p397_p3, %p391_p0 }
   0xa   :  { %401 = shalt.err (!%p398_p4)
}
   0xb   :  { %s427_s18 = smov 64   ;;  %s428_s19 = smov 4  }
   0xc   :  { %24 = dma.hbm_to_vmem [thread:$0]  %s473_s1, 1024, %s19_s16, [#allocation3], %s427_s18, %s427_s18, %s428_s19  }
   0xd   :  { %s429_s22 = smov [#allocation4]  }
   0xe   :  { %s32_s23 = sshll.u32 %s429_s22, 4  ;;  %s33_s23 = int_to_ptr.vmem [resolvable:$true] %s32_s23 }
   0xf   :  { %s410_s24 = scalar_lea.vmem %s33_s23, 1024  ;;  %p415_p6 = scmp.lt.s32.totalorder %s33_s23, %s33_s23 }
  0x10   :  { %p411_p5 = scmp.ne.s32.totalorder %s33_s23, %s410_s24  ;;  %p416_p7 = scmp.lt.s32.totalorder %s410_s24, %s410_s24 }
  0x12   :  { %p417_p8 = por %p416_p7, %p415_p6 }
  0x14   :  { %p418_p9 = pnand %p417_p8, %p411_p5 }
  0x16   :  { %421 = shalt.err (!%p418_p9)
}
  0x17   :  { %38 = dma.hbm_to_vmem [thread:$0]  %s475_s3, 1024, %s33_s23, [#allocation5], %s427_s18, %s427_s18, %s428_s19  }
  0x18   :  { %422 = dma.done.wait [#allocation3], 1024  }
  0x19   :  { %423 = vsyncadd [#allocation3], 4294966272 }
  0x1a   :  { %424 = dma.done.wait [#allocation5], 1024  }
  0x1b   :  { %425 = vsyncadd [#allocation5], 4294966272  ;;  %v430_v0 = vmov 0.0   ;;  %vm431_vm0 = vmmov 0   ;;  %v362_v1 = vld [vmem:[#allocation2 + $0x38] sm:$0xff]   ;;  %v363_v2 = vld [vmem:[#allocation2 + $0x30] sm:$0xff]  }
  0x1c   :  { %316 = vmatprep.subr.bf16.mxu0 %v430_v0  ;;  %332 = vmatprep.mubr.msk.bf16.mxu0 %vm431_vm0, %v430_v0  ;;  %v364_v3 = vld [vmem:[#allocation2 + $0x28] sm:$0xff]   ;;  %v365_v4 = vld [vmem:[#allocation2 + $0x20] sm:$0xff]   ;;  %v366_v5 = vld [vmem:[#allocation2 + $0x18] sm:$0xff]   ;;  %vm159_vm1 = vcmask 1041408  }
  0x1d   :  { %336 = vmatprep.subr.bf16.mxu1 %v430_v0  ;;  %352 = vmatprep.mubr.msk.bf16.mxu1 %vm431_vm0, %v430_v0  ;;  %v367_v6 = vld [vmem:[#allocation2 + $0x10] sm:$0xff]   ;;  %v368_v7 = vld [vmem:[#allocation2 + $0x8] sm:$0xff]   ;;  %v369_v8 = vld [vmem:[#allocation2] sm:$0xff]  }
  0x1e   :  { %317 = vmatpush3.bf16.msra.mxu0 %v362_v1  ;;  %v46_v9 = vld [vmem:[%s472_s0] sm:$0x3]  ;;  %v370_v11 = vld [vmem:[#allocation4 + $0x38] sm:$0xff]   ;;  %v371_v12 = vld [vmem:[#allocation4 + $0x30] sm:$0xff]  }
  0x1f   :  { %318 = vmatprep.subr.bf16.mxu0 %v430_v0  ;;  %v47_v10 = vpack.c.bf16 %v46_v9, %v46_v9  ;;  %337 = vmatpush3.bf16.msra.mxu1 %v370_v11  ;;  %v372_v13 = vld [vmem:[#allocation4 + $0x28] sm:$0xff]   ;;  %v281_v14 = vld [vmem:[%s474_s2] ss:$0 sm:$0xff]  ;;  %v374_v22 = vld [vmem:[#allocation4 + $0x18] sm:$0xff]  }
  0x20   :  { %338 = vmatprep.subr.bf16.mxu1 %v430_v0  ;;  %v373_v21 = vld [vmem:[#allocation4 + $0x20] sm:$0xff]   ;;  %v375_v23 = vld [vmem:[#allocation4 + $0x10] sm:$0xff]   ;;  %v376_v24 = vld [vmem:[#allocation4 + $0x8] sm:$0xff]  }
  0x21   :  { %v377_v25 = vld [vmem:[#allocation4] sm:$0xff]  }
  0x22   :  { %319 = vmatpush3.bf16.msra.mxu0 %v363_v2 }
  0x23   :  { %320 = vmatprep.subr.bf16.mxu0 %v430_v0  ;;  %339 = vmatpush3.bf16.msra.mxu1 %v371_v12 }
  0x24   :  { %340 = vmatprep.subr.bf16.mxu1 %v430_v0 }
  0x26   :  { %321 = vmatpush3.bf16.msra.mxu0 %v364_v3 }
  0x27   :  { %322 = vmatprep.subr.bf16.mxu0 %v430_v0  ;;  %341 = vmatpush3.bf16.msra.mxu1 %v372_v13 }
  0x28   :  { %342 = vmatprep.subr.bf16.mxu1 %v430_v0 }
  0x2a   :  { %323 = vmatpush3.bf16.msra.mxu0 %v365_v4 }
  0x2b   :  { %324 = vmatprep.subr.bf16.mxu0 %v430_v0  ;;  %343 = vmatpush3.bf16.msra.mxu1 %v373_v21 }
  0x2c   :  { %344 = vmatprep.subr.bf16.mxu1 %v430_v0 }
  0x2e   :  { %325 = vmatpush3.bf16.msra.mxu0 %v366_v5 }
  0x2f   :  { %326 = vmatprep.subr.bf16.mxu0 %v430_v0  ;;  %345 = vmatpush3.bf16.msra.mxu1 %v374_v22 }
  0x30   :  { %346 = vmatprep.subr.bf16.mxu1 %v430_v0 }
  0x32   :  { %327 = vmatpush3.bf16.msra.mxu0 %v367_v6 }
  0x33   :  { %328 = vmatprep.subr.bf16.mxu0 %v430_v0  ;;  %347 = vmatpush3.bf16.msra.mxu1 %v375_v23 }
  0x34   :  { %348 = vmatprep.subr.bf16.mxu1 %v430_v0 }
  0x36   :  { %329 = vmatpush3.bf16.msra.mxu0 %v368_v7 }
  0x37   :  { %330 = vmatprep.subr.bf16.mxu0 %v430_v0  ;;  %349 = vmatpush3.bf16.msra.mxu1 %v376_v24 }
  0x38   :  { %350 = vmatprep.subr.bf16.mxu1 %v430_v0 }
  0x3a   :  { %331 = vmatpush3.bf16.msra.mxu0 %v369_v8 }
  0x3b   :  { %351 = vmatpush3.bf16.msra.mxu1 %v377_v25 }
  0x3d   :  { %333 = vmatmul.mubr.bf16.vlgmr.msra.gmra.mxu0 %v47_v10 }
  0xfd   :  { %v153_v15 = vpop.f32.mrf.mxu0 }
  0xfe   :  { %v154_v16 = vadd.f32 %v281_v14, %v153_v15 }
  0xff   :  { %v334_v17 = vpop.f32.mrf.mxu0 }
 0x100   :  { %v160_v18 = vsel %vm159_vm1, %v154_v16, -inf }
 0x101   :  { %v156_v19 = vpop.f32.mrf.mxu0  ;;  %161 = vmax.xlane.f32.xlu0 %v160_v18 }
 0x103   :  { %v335_v20 = vpop.f32.mrf.mxu0 }
 0x18a   :  { %v162_v26 = vpop.xlane.xlu0 %161 }
 0x18b   :  { %v163_v27 = vsub.f32 %v154_v16, %v162_v26 }
 0x18d   :  { %v164_v28 = vmul.f32 1.442695, %v163_v27 }
 0x18f   :  { %378 = vpow2.f32 %v164_v28 }
 0x19c   :  { %v379_v29 = vpop.eup %378 }
 0x19d   :  { %v166_v30 = vpack.c.bf16 %v379_v29, %v379_v29 }
 0x19f   :  { %353 = vmatmul.mubr.bf16.vlgmr.msra.gmra.mxu1 %v166_v30  ;;  %v271_v35 = vunpack.c.l.bf16 %v166_v30 }
 0x25f   :  { %v265_v31 = vpop.f32.mrf.mxu1 }
 0x260   :  { %380 = vrcp.f32 %v265_v31 }
 0x261   :  { %v354_v32 = vpop.f32.mrf.mxu1 }
 0x263   :  { %v268_v33 = vpop.f32.mrf.mxu1 }
 0x265   :  { %v355_v34 = vpop.f32.mrf.mxu1 }
 0x26d   :  { %v381_v36 = vpop.eup %380 }
 0x26e   :  { %v273_v37 = vmul.f32 %v381_v36, %v271_v35 }
 0x270   :  { %274 = vst [vmem:[%s476_s4] sm:$0x3] %v273_v37 }
 0x271   :  { %279 = vsyncpa [#allocation3], 1 }
 0x272   :  { %280 = vsyncpa [#allocation5], 1 }

</bundles_post_ra>
